<compile_context>
chip_gen: v5e
topology: v5e:2x2
jax: 0.10.0
libtpu: 0.0.40
codegen_flags: <defaults>
</compile_context>

<pallas_src>
import functools

import jax
import jax.numpy as jnp
from jax.experimental import pallas as pl
from jax.experimental.pallas import tpu as pltpu


# ---------------------------------------------------------------------------
# Kernel: one batch-tile of the Attention forward.
# ---------------------------------------------------------------------------
def _attention_kernel(h_ref, att_feats_ref, p_att_ref, w_ref, b_ref, alpha_ref,
                      *rest, with_mask, alpha_on_mxu):
    if with_mask:
        mask_ref, out_ref = rest
    else:
        (out_ref,) = rest

    # Streams may arrive in bf16; all math is f32 (portable incl. v5e).
    h = h_ref[...].astype(jnp.float32)                  # (BB, H)
    att_feats = att_feats_ref[...].astype(jnp.float32)  # (BB, L, H)
    p_att = p_att_ref[...].astype(jnp.float32)          # (BB, L, A)
    bb, l, a = p_att.shape

    # h2att linear: one lane-dense MXU matmul + bias.
    att_h = jnp.dot(h, w_ref[...], preferred_element_type=jnp.float32) + b_ref[...]  # (BB, A)

    # tanh(p_att + att_h)                                # (BB, L, A)
    dot = jnp.tanh(p_att + att_h[:, None, :])

    # alpha projection -> scores, kept sublane-major (BB, L, 1) so both the
    # softmax reductions and the final weighted sum avoid lane<->sublane moves.
    if alpha_on_mxu:
        # alpha_ref is (A, 1).  Reshapes are layout-preserving (L % 8 == 0).
        scores = jnp.dot(dot.reshape(bb * l, a), alpha_ref[...],
                         preferred_element_type=jnp.float32).reshape(bb, l, 1)
    else:
        # alpha_ref is (1, A).  VPU multiply + lane reduction fallback.
        scores = jnp.sum(dot * alpha_ref[...][None, :, :], axis=-1, keepdims=True)
    # NOTE: alpha_net's scalar bias is folded out (softmax shift-invariance).

    # Numerically stable softmax over L (sublane axis); denominator on the EUP.
    scores = scores - jnp.max(scores, axis=1, keepdims=True)
    e = jnp.exp(scores)
    if with_mask:
        # Matches PyTorch exactly: softmax(s)*m / sum(softmax(s)*m) == e*m/sum(e*m).
        e = e * mask_ref[...].astype(jnp.float32)        # mask block is (BB, L, 1)
    weight = e * pl.reciprocal(jnp.sum(e, axis=1, keepdims=True), approx=True)

    # Weighted sum of attention features (lane-broadcast mul + sublane reduce).
    att_res = jnp.sum(weight * att_feats, axis=1)        # (BB, H)
    out_ref[...] = att_res.astype(out_ref.dtype)


# ---------------------------------------------------------------------------
# Batch-tile auto-sizing from a VMEM budget.
# ---------------------------------------------------------------------------
def _auto_block_b(B, L, H, A, feat_itemsize, mask_itemsize,
                  vmem_budget_bytes):
    # Streamed bytes per batch row (x2: default double-buffered pipeline) plus
    # the in-kernel f32 working copies (upcasts + tanh output).
    stream = L * (H + A) * feat_itemsize + 2 * H * 4 + L * mask_itemsize
    work = L * (H + 2 * A) * 4
    per_row = 2 * stream + work
    cap = max(1, int(vmem_budget_bytes) // per_row)

    # Legal tiles: divisors of B that are multiples of 8 (f32 sublane tile for
    # the 2-D (block_b, H) specs) or the full batch.
    divs = [d for d in range(1, B + 1) if B % d == 0 and (d % 8 == 0 or d == B)]
    fit = [d for d in divs if d <= cap]
    # Prefer >= 2 grid steps so v7x's second TensorCore has work to shard.
    multi = [d for d in fit if B // d >= 2]
    if multi:
        return max(multi)
    if fit:
        return max(fit)
    return min(divs)


# ---------------------------------------------------------------------------
# Host-side wrapper
# ---------------------------------------------------------------------------
def attention(params, h, att_feats, p_att_feats, att_masks=None, *,
              block_b=None, vmem_budget_bytes=24 * 1024 * 1024):
    B, L, H = att_feats.shape
    A = p_att_feats.shape[-1]
    assert p_att_feats.shape[:2] == (B, L)
    assert h.shape == (B, H)

    feat_itemsize = max(jnp.dtype(att_feats.dtype).itemsize,
                        jnp.dtype(p_att_feats.dtype).itemsize)
    mask_itemsize = 0 if att_masks is None else jnp.dtype(att_masks.dtype).itemsize
    if block_b is None:
        block_b = _auto_block_b(B, L, H, A, feat_itemsize, mask_itemsize,
                                vmem_budget_bytes)
    assert B % block_b == 0, "batch must be divisible by the batch tile"

    # MXU alpha projection needs layout-preserving reshapes -> L % 8 == 0.
    alpha_on_mxu = (L % 8 == 0)

    w = params["h2att_w"]                                # (H, A)
    b = params["h2att_b"].reshape(1, A)                  # (1, A)
    alpha = (params["alpha_w"].reshape(A, 1) if alpha_on_mxu
             else params["alpha_w"].reshape(1, A))

    grid = (B // block_b,)
    in_specs = [
        pl.BlockSpec((block_b, H), lambda i: (i, 0)),        # h
        pl.BlockSpec((block_b, L, H), lambda i: (i, 0, 0)),  # att_feats stream (native dtype)
        pl.BlockSpec((block_b, L, A), lambda i: (i, 0, 0)),  # p_att_feats stream (native dtype)
        pl.BlockSpec((H, A), lambda i: (0, 0)),              # h2att weight (VMEM-resident)
        pl.BlockSpec((1, A), lambda i: (0, 0)),              # h2att bias
        pl.BlockSpec(alpha.shape, lambda i: (0, 0)),         # alpha_net weight
    ]
    args = [h, att_feats, p_att_feats, w, b, alpha]

    with_mask = att_masks is not None
    if with_mask:
        # Native dtype, sublane-major (B, L, 1); cast happens in-kernel.
        mask3 = att_masks.reshape(B, L, 1)
        in_specs.append(pl.BlockSpec((block_b, L, 1), lambda i: (i, 0, 0)))
        args.append(mask3)

    return pl.pallas_call(
        functools.partial(_attention_kernel, with_mask=with_mask,
                          alpha_on_mxu=alpha_on_mxu),
        out_shape=jax.ShapeDtypeStruct((B, H), h.dtype),
        grid=grid,
        in_specs=in_specs,
        out_specs=pl.BlockSpec((block_b, H), lambda i: (i, 0)),
        compiler_params=pltpu.CompilerParams(
            dimension_semantics=("parallel",),        # batch tiles are independent
            vmem_limit_bytes=32 * 1024 * 1024),       # covers the 24 MiB budget; raises v5e default
    )(*args)


# ---------------------------------------------------------------------------
# Pure-JAX reference (mirrors the PyTorch forward, incl. the alpha_net bias).
# ---------------------------------------------------------------------------
def attention_ref(params, h, att_feats, p_att_feats, att_masks=None):
    att_h = h @ params["h2att_w"] + params["h2att_b"]
    dot = jnp.tanh(p_att_feats + att_h[:, None, :])
    scores = jnp.einsum("bla,a->bl", dot, params["alpha_w"]) + params["alpha_b"]
    weight = jax.nn.softmax(scores, axis=1)
    if att_masks is not None:
        weight = weight * att_masks.astype(weight.dtype)
        weight = weight / weight.sum(1, keepdims=True)
    return jnp.einsum("bl,blh->bh", weight, att_feats)


# ---------------------------------------------------------------------------
# Deterministic synthetic parameters (no checkpoint load).
# ---------------------------------------------------------------------------
def init_params(key, rnn_size, att_hid_size):
    k1, k2, k3, k4 = jax.random.split(key, 4)
    sh = 1.0 / jnp.sqrt(jnp.float32(rnn_size))
    sa = 1.0 / jnp.sqrt(jnp.float32(att_hid_size))
    return {
        "h2att_w": jax.random.normal(k1, (rnn_size, att_hid_size), jnp.float32) * sh,
        "h2att_b": jax.random.normal(k2, (att_hid_size,), jnp.float32) * sh,
        "alpha_w": jax.random.normal(k3, (att_hid_size,), jnp.float32) * sa,
        "alpha_b": jax.random.normal(k4, (), jnp.float32) * sa,
    }


if __name__ == "__main__":
    # batch=16, att_len=8, rnn_size=128, att_hid=128
    B, L, H, A = 16, 8, 128, 128

    root = jax.random.PRNGKey(0)
    kh, ka, kp, kw, km = jax.random.split(root, 5)
    h = jax.random.normal(kh, (B, H), jnp.float32)
    att_feats_f32 = jax.random.normal(ka, (B, L, H), jnp.float32)
    p_att_f32 = jax.random.normal(kp, (B, L, A), jnp.float32)
    params = init_params(kw, H, A)

    # Stream the two dominant HBM inputs in bf16 (halves DMA bytes); the kernel
    # upcasts to f32.  The reference is fed the same bf16 data (upcast) so the
    # comparison isolates the kernel, not the input quantization.
    att_feats = att_feats_f32.astype(jnp.bfloat16)
    p_att_feats = p_att_f32.astype(jnp.bfloat16)
    att_feats_hi = att_feats.astype(jnp.float32)
    p_att_hi = p_att_feats.astype(jnp.float32)

    # --- att_masks=None path -------------------------------------------------
    out = attention(params, h, att_feats, p_att_feats)
    jax.block_until_ready(out)
    ref = attention_ref(params, h, att_feats_hi, p_att_hi)
    assert jnp.allclose(out, ref, atol=1e-2, rtol=1e-2), "unmasked path mismatch"

    # --- masked path ---------------------------------------------------------
    lens = jax.random.randint(km, (B,), 1, L + 1)
    masks = (jnp.arange(L)[None, :] < lens[:, None]).astype(jnp.float32)
    out_m = attention(params, h, att_feats, p_att_feats, masks)
    jax.block_until_ready(out_m)
    ref_m = attention_ref(params, h, att_feats_hi, p_att_hi, masks)
    assert jnp.allclose(out_m, ref_m, atol=1e-2, rtol=1e-2), "masked path mismatch"

    print("KERNEL_OK")
</pallas_src>

<mosaic_0001>
module attributes {stable_mosaic.version = 11 : i64} {
  func.func @_attention_kernel(%arg0: i32, %arg1: memref<8x128xf32, #tpu.memory_space<vmem>>, %arg2: memref<8x8x128xbf16, #tpu.memory_space<vmem>>, %arg3: memref<8x8x128xbf16, #tpu.memory_space<vmem>>, %arg4: memref<128x128xf32, #tpu.memory_space<vmem>>, %arg5: memref<1x128xf32, #tpu.memory_space<vmem>>, %arg6: memref<128x1xf32, #tpu.memory_space<vmem>>, %arg7: memref<8x128xf32, #tpu.memory_space<vmem>>) attributes {dimension_semantics = [#tpu.dimension_semantics<parallel>], iteration_bounds = array<i64: 2>, scalar_prefetch = 0 : i64, scratch_operands = 0 : i64, tpu.core_type = #tpu.core_type<tc>, window_params = [{transform_indices = @transform_0, window_bounds = array<i64: 8, 128>}, {transform_indices = @transform_1, window_bounds = array<i64: 8, 8, 128>}, {transform_indices = @transform_2, window_bounds = array<i64: 8, 8, 128>}, {pipeline_mode = #tpu.pipeline_mode<synchronous>, transform_indices = @transform_3, window_bounds = array<i64: 128, 128>}, {pipeline_mode = #tpu.pipeline_mode<synchronous>, transform_indices = @transform_4, window_bounds = array<i64: 1, 128>}, {pipeline_mode = #tpu.pipeline_mode<synchronous>, transform_indices = @transform_5, window_bounds = array<i64: 128, 1>}, {transform_indices = @transform_6, window_bounds = array<i64: 8, 128>}]} {
    %c0 = arith.constant 0 : index
    %c0_0 = arith.constant 0 : index
    %0 = vector.load %arg1[%c0, %c0_0] : memref<8x128xf32, #tpu.memory_space<vmem>>, vector<8x128xf32>
    %c0_1 = arith.constant 0 : index
    %c0_2 = arith.constant 0 : index
    %c0_3 = arith.constant 0 : index
    %1 = vector.load %arg2[%c0_1, %c0_2, %c0_3] : memref<8x8x128xbf16, #tpu.memory_space<vmem>>, vector<8x8x128xbf16>
    %2 = arith.extf %1 : vector<8x8x128xbf16> to vector<8x8x128xf32>
    %c0_4 = arith.constant 0 : index
    %c0_5 = arith.constant 0 : index
    %c0_6 = arith.constant 0 : index
    %3 = vector.load %arg3[%c0_4, %c0_5, %c0_6] : memref<8x8x128xbf16, #tpu.memory_space<vmem>>, vector<8x8x128xbf16>
    %4 = arith.extf %3 : vector<8x8x128xbf16> to vector<8x8x128xf32>
    %c0_7 = arith.constant 0 : index
    %c0_8 = arith.constant 0 : index
    %5 = vector.load %arg4[%c0_7, %c0_8] : memref<128x128xf32, #tpu.memory_space<vmem>>, vector<128x128xf32>
    %cst = arith.constant dense<0.000000e+00> : vector<8x128xf32>
    %6 = tpu.matmul %0, %5, %cst {dimension_numbers = #tpu.dot_dimension_numbers<[1], [0], [0], [1], [0, 0, 1, 1], [], []>} : vector<8x128xf32>, vector<128x128xf32>, vector<8x128xf32> -> vector<8x128xf32>
    %c0_9 = arith.constant 0 : index
    %c0_10 = arith.constant 0 : index
    %7 = vector.load %arg5[%c0_9, %c0_10] : memref<1x128xf32, #tpu.memory_space<vmem>>, vector<1x128xf32>
    %8 = vector.broadcast %7 : vector<1x128xf32> to vector<8x128xf32>
    %9 = arith.addf %6, %8 : vector<8x128xf32>
    %10 = vector.shape_cast %9 : vector<8x128xf32> to vector<8x1x128xf32>
    %11 = vector.broadcast %10 : vector<8x1x128xf32> to vector<8x8x128xf32>
    %12 = arith.addf %4, %11 : vector<8x8x128xf32>
    %13 = math.tanh %12 : vector<8x8x128xf32>
    %14 = vector.shape_cast %13 : vector<8x8x128xf32> to vector<64x128xf32>
    %c0_11 = arith.constant 0 : index
    %c0_12 = arith.constant 0 : index
    %15 = vector.load %arg6[%c0_11, %c0_12] : memref<128x1xf32, #tpu.memory_space<vmem>>, vector<128x1xf32>
    %cst_13 = arith.constant dense<0.000000e+00> : vector<64x1xf32>
    %16 = tpu.matmul %14, %15, %cst_13 {dimension_numbers = #tpu.dot_dimension_numbers<[1], [0], [0], [1], [0, 0, 1, 1], [], []>} : vector<64x128xf32>, vector<128x1xf32>, vector<64x1xf32> -> vector<64x1xf32>
    %17 = vector.shape_cast %16 : vector<64x1xf32> to vector<8x8x1xf32>
    %cst_14 = arith.constant dense<0xFF800000> : vector<8x1xf32>
    %18 = vector.multi_reduction <maximumf>, %17, %cst_14 [1] : vector<8x8x1xf32> to vector<8x1xf32>
    %19 = vector.shape_cast %18 : vector<8x1xf32> to vector<8x1x1xf32>
    %20 = vector.broadcast %19 : vector<8x1x1xf32> to vector<8x8x1xf32>
    %21 = arith.subf %17, %20 : vector<8x8x1xf32>
    %22 = math.exp %21 : vector<8x8x1xf32>
    %cst_15 = arith.constant dense<0.000000e+00> : vector<8x1xf32>
    %23 = vector.multi_reduction <add>, %22, %cst_15 [1] : vector<8x8x1xf32> to vector<8x1xf32>
    %24 = vector.shape_cast %23 : vector<8x1xf32> to vector<8x1x1xf32>
    %25 = tpu.reciprocal %24 {approx = true} : vector<8x1x1xf32> -> vector<8x1x1xf32>
    %26 = vector.broadcast %25 : vector<8x1x1xf32> to vector<8x8x1xf32>
    %27 = arith.mulf %22, %26 : vector<8x8x1xf32>
    %28 = vector.broadcast %27 : vector<8x8x1xf32> to vector<8x8x128xf32>
    %29 = arith.mulf %28, %2 : vector<8x8x128xf32>
    %cst_16 = arith.constant dense<0.000000e+00> : vector<8x128xf32>
    %30 = vector.multi_reduction <add>, %29, %cst_16 [1] : vector<8x8x128xf32> to vector<8x128xf32>
    %c0_17 = arith.constant 0 : index
    %c0_18 = arith.constant 0 : index
    %31 = vector.load %arg7[%c0_17, %c0_18] : memref<8x128xf32, #tpu.memory_space<vmem>>, vector<8x128xf32>
    tpu.vector_store %arg7[%c0_17, %c0_18], %30 {strides = array<i32>} : memref<8x128xf32, #tpu.memory_space<vmem>>, vector<8x128xf32>,
    return
  }
  func.func @transform_0(%arg0: i32) -> (i32, i32) {
    %c0_i32 = arith.constant 0 : i32
    %c0_i32_0 = arith.constant 0 : i32
    return %arg0, %c0_i32 : i32, i32
  }
  func.func @transform_1(%arg0: i32) -> (i32, i32, i32) {
    %c0_i32 = arith.constant 0 : i32
    %c0_i32_0 = arith.constant 0 : i32
    %c0_i32_1 = arith.constant 0 : i32
    return %arg0, %c0_i32, %c0_i32_0 : i32, i32, i32
  }
  func.func @transform_2(%arg0: i32) -> (i32, i32, i32) {
    %c0_i32 = arith.constant 0 : i32
    %c0_i32_0 = arith.constant 0 : i32
    %c0_i32_1 = arith.constant 0 : i32
    return %arg0, %c0_i32, %c0_i32_0 : i32, i32, i32
  }
  func.func @transform_3(%arg0: i32) -> (i32, i32) {
    %c0_i32 = arith.constant 0 : i32
    %c0_i32_0 = arith.constant 0 : i32
    %c0_i32_1 = arith.constant 0 : i32
    return %c0_i32, %c0_i32_0 : i32, i32
  }
  func.func @transform_4(%arg0: i32) -> (i32, i32) {
    %c0_i32 = arith.constant 0 : i32
    %c0_i32_0 = arith.constant 0 : i32
    %c0_i32_1 = arith.constant 0 : i32
    return %c0_i32, %c0_i32_0 : i32, i32
  }
  func.func @transform_5(%arg0: i32) -> (i32, i32) {
    %c0_i32 = arith.constant 0 : i32
    %c0_i32_0 = arith.constant 0 : i32
    %c0_i32_1 = arith.constant 0 : i32
    return %c0_i32, %c0_i32_0 : i32, i32
  }
  func.func @transform_6(%arg0: i32) -> (i32, i32) {
    %c0_i32 = arith.constant 0 : i32
    %c0_i32_0 = arith.constant 0 : i32
    return %arg0, %c0_i32 : i32, i32
  }
}

</mosaic_0001>

<bundles_post_ra>
// kernel: tpu_custom_call.1
= control target key start
LH: loop header
LB: loop body
LE: loop exit
PB: predicated region body
PF: predicated region fallthrough
CT: control target
= control target key end

     0   :  { %s1663_s0 = inlined_call_operand.hbm [shape: f32[16,128], index: 0, kind: input, shape index: {}]   ;;  %s1664_s1 = inlined_call_operand.hbm [shape: bf16[16,8,128], index: 1, kind: input, shape index: {}]   ;;  %s1665_s2 = inlined_call_operand.hbm [shape: bf16[16,8,128], index: 2, kind: input, shape index: {}]   ;;  %s1666_s3 = inlined_call_operand.vmem [shape: f32[128,128], index: 3, kind: input, shape index: {}]   ;;  %s1667_s4 = inlined_call_operand.vmem [shape: f32[1,128], index: 4, kind: input, shape index: {}]   ;;  %s1668_s5 = inlined_call_operand.vmem [shape: f32[128,1], index: 5, kind: input, shape index: {}]   ;;  %s1669_s6 = inlined_call_operand.hbm [shape: f32[16,128], index: 6, kind: output, shape index: {}]  }
   0x1   :  { %1678 = sst [smem:[#allocation17_spill]] %s1664_s1 }
   0x2   :  { %11 = vsyncpa [#allocation3], 0 }
   0x3   :  { %13 = vsyncpa [#allocation3 + $0x1], 0 }
   0x4   :  { %14 = vsyncpa [#allocation6], 0 }
   0x5   :  { %16 = vsyncpa [#allocation6 + $0x1], 0 }
   0x6   :  { %17 = vsyncpa [#allocation4], 0 }
   0x7   :  { %19 = vsyncpa [#allocation4 + $0x1], 0  ;;  %s1327_s21 = smov 0   ;;  %s1329_s22 = smov 0  }
   0x8   :  { %s1331_s23 = smov 0   ;;  %s1333_s24 = smov 0  }
   0x9 LB: > { %1679 = sst [smem:[#allocation12_spill]] %s1283_s23  ;;  %s1348_s25 = sadd.s32 4294967295, %s1287_s24   ;;  %s1287_s24 = sphi %s1333_s24, %s1696_s24   ;;  %s1283_s23 = sphi %s1331_s23, %s1698_s23   ;;  %s1279_s22 = sphi %s1329_s22, %s1700_s22   ;;  %s1275_s21 = sphi %s1327_s21, %s1699_s21  }
   0xa   : > { %1680 = sst [smem:[#allocation13_spill]] %s1287_s24  ;;  %s924_s26 = sadd.s32 4294967294, %s1287_s24  }
   0xb   : > { %s1352_s27 = sadd.s32 1, %s1287_s24   ;;  %s32_s28 = sadd.s32 1, %s1283_s23 }
   0xc   : > { %1681 = sst [smem:[#allocation14_spill]] %s1352_s27  ;;  %s29_s29 = ssub.s32 %s1287_s24, %s1352_s27 }
   0xd   : > { %p39_p0 = scmp.ne.s32.totalorder %s1283_s23, %s1279_s22  ;;  %p30_p1 = scmp.eq.s32.totalorder %s29_s29, 0 }
   0xe   : > { %p40_p2 = scmp.eq.s32.totalorder %s1287_s24, 0  ;;  %p45_p3 = scmp.ne.s32.totalorder %s1279_s22, %s1275_s21 }
   0xf   : > { %p46_p4 = scmp.eq.s32.totalorder %s1348_s25, 0  ;;  %p184_p7 = scmp.eq.s32.totalorder %s1348_s25, 1 }
  0x10   : > { %s1364_s30 = scalar_select %p30_p1, %s1283_s23, %s32_s28  }
  0x11   : > { %p41_p5 = por %p40_p2, %p39_p0  ;;  %p1366_p6 = por %p46_p4, %p45_p3 }
  0x12   : > { %1682 = sst [smem:[#allocation15_spill]] %s1364_s30  ;;  %p190_p8 = scmp.eq.s32.totalorder %s924_s26, 1 }
  0x13   : > { %p1038_p10 = scmp.lt.s32.totalorder %s1287_s24, 2  ;;  %p1373_p11 = por %p184_p7, %p39_p0 }
  0x14   : > { %p1377_p12 = por %p190_p8, %p45_p3  ;;  %s1382_s10 = sand.u32 1, %s1283_s23  }
  0x15   : > { %p1384_p13 = pnand %p1038_p10, %p41_p5  ;;  %s238_s12 = sand.u32 1, %s1287_s24  }
  0x16   : > { %s1685_s9 = scalar_select %p1377_p12, 1, 0 }
  0x17   : > { %s1670_s13 = sshll.u32 %s1382_s10, 5  ;;  %s944_s14 = sshll.u32 %s1287_s24, 5 }
  0x18   : > { %1686 = sst [smem:[#allocation16_spill]] %s1685_s9  ;;  %s242_s18 = scalar_lea.vmem [#allocation5], %s1670_s13 }
  0x19   : > { %s1688_s1 = sld [smem:[#allocation17_spill]]  ;;  %s250_s19 = sshll.u32 %s242_s18, 4  ;;  %s251_s19 = int_to_ptr.vmem [resolvable:$true] %s250_s19 }
  0x1a   : > { %s1396_s26 = scalar_lea.sflag [#allocation6], %s238_s12  ;;  %p1131_p1 = pneg %p1384_p13 }
  0x1f   : > { %s247_s17 = scalar_lea.hbm %s1688_s1, %s944_s14  ;;  %s1134_s13 = scalar_lea.hbm %s1688_s1, 64 }
  0x20   : > { %s248_s20 = sshll.u32 %s247_s17, 4  ;;  %s249_s20 = int_to_ptr.hbm [resolvable:$true] %s248_s20 }
  0x21   : > { %s1127_s28 = sshra.s32 %s249_s20, 4  ;;  %s1128_s28 = int_to_ptr.hbm [resolvable:$true] %s1127_s28 }
  0x22   : > { %s1129_s29 = scalar_lea.hbm %s1128_s28, 32  ;;  %p1135_p4 = scmp.lt.s32.totalorder %s1128_s28, %s1688_s1 }
  0x23   : > { %p1130_p0 = scmp.ne.s32.totalorder %s1128_s28, %s1129_s29  ;;  %p1136_p5 = scmp.lt.s32.totalorder %s1134_s13, %s1129_s29 }
  0x25   : > { %p1132_p2 = pnand %p1131_p1, %p1130_p0  ;;  %p1137_p7 = por %p1136_p5, %p1135_p4 }
  0x27   : > { %p1133_p3 = pneg %p1132_p2 }
  0x29   : > { %p1138_p8 = pnand %p1137_p7, %p1133_p3 }
  0x2b   : > { %1141 = shalt.err (!%p1138_p8)
}
  0x2c   : > { %s1672_s12 = smov 64   ;;  %s1673_s30 = smov 4  }
  0x2d   : > { %1030 = dma.hbm_to_vmem [thread:$0]  (!%p1384_p13), %s249_s20, 512, %s251_s19, %s1396_s26, %s1672_s12, %s1672_s12, %s1673_s30  }
  0x2e   : > { %s269_s13 = scalar_lea.hbm %s1665_s2, %s944_s14  ;;  %s1689_s29 = sshll.u32 %s1382_s10, 5 }
  0x2f   : > { %s264_s16 = scalar_lea.vmem [#allocation7], %s1689_s29  ;;  %s270_s17 = sshll.u32 %s269_s13, 4  ;;  %s1422_s17 = int_to_ptr.hbm [resolvable:$true] %s270_s17 }
  0x30   : > { %s272_s18 = sshll.u32 %s264_s16, 4  ;;  %p935_p10 = scmp.ge.s32.totalorder %s1287_s24, 1  ;;  %s1420_s18 = int_to_ptr.vmem [resolvable:$true] %s272_s18 }
  0x31   : > { %p280_p0 = scmp.lt.s32.totalorder %s1287_s24, 3  ;;  %s927_s1 = sshll.u32 %s1382_s10, 3 }
  0x32   : > { %s928_s23 = sshll.u32 %s1287_s24, 3  ;;  %s223_s28 = scalar_lea.vmem [#allocation2], %s927_s1 }
  0x33   : > { %p1428_p2 = pnand %p935_p10, %p280_p0  ;;  %s227_s15 = scalar_lea.hbm %s1663_s0, %s928_s23 }
  0x34   : > { %s231_s29 = sshll.u32 %s223_s28, 4  ;;  %s229_s13 = sshll.u32 %s227_s15, 4  ;;  %s232_s29 = int_to_ptr.vmem [resolvable:$true] %s231_s29  ;;  %s230_s13 = int_to_ptr.hbm [resolvable:$true] %s229_s13 }
  0x35   : > { %s220_s16 = scalar_lea.sflag [#allocation3], %s1382_s10  ;;  %s1157_s12 = sshra.s32 %s230_s13, 4  ;;  %s1158_s12 = int_to_ptr.hbm [resolvable:$true] %s1157_s12 }
  0x36   : > { %s1159_s30 = scalar_lea.hbm %s1158_s12, 8  ;;  %s1164_s9 = scalar_lea.hbm %s1663_s0, 16 }
  0x37   : > { %p1160_p3 = scmp.ne.s32.totalorder %s1158_s12, %s1159_s30  ;;  %p1165_p7 = scmp.lt.s32.totalorder %s1158_s12, %s1663_s0 }
  0x38   : > { %p1166_p8 = scmp.lt.s32.totalorder %s1164_s9, %s1159_s30 }
  0x39   : > { %p1162_p4 = pnand %p1160_p3, %p1131_p1 }
  0x3a   : > { %p1167_p10 = por %p1166_p8, %p1165_p7 }
  0x3b   : > { %p1163_p5 = pneg %p1162_p4 }
  0x3d   : > { %p1168_p0 = pnand %p1167_p10, %p1163_p5 }
  0x3f   : > { %1171 = shalt.err (!%p1168_p0)
}
  0x40   : > { %1027 = dma.hbm_to_vmem [thread:$0]  (!%p1384_p13), %s230_s13, 128, %s232_s29, %s220_s16  }
  0x41   : > { %s1187_s1 = sshra.s32 %s1422_s17, 4  ;;  %s1194_s30 = scalar_lea.hbm %s1665_s2, 64  ;;  %s1188_s1 = int_to_ptr.hbm [resolvable:$true] %s1187_s1 }
  0x42   : > { %s1189_s10 = scalar_lea.hbm %s1188_s1, 32  ;;  %p1195_p5 = scmp.lt.s32.totalorder %s1188_s1, %s1665_s2 }
  0x43   : > { %p1190_p3 = scmp.ne.s32.totalorder %s1188_s1, %s1189_s10  ;;  %p1196_p7 = scmp.lt.s32.totalorder %s1194_s30, %s1189_s10 }
  0x45   : > { %p1192_p4 = pnand %p1190_p3, %p1131_p1  ;;  %p1197_p8 = por %p1196_p7, %p1195_p5 }
  0x47   : > { %p1193_p9 = pneg %p1192_p4 }
  0x49   : > { %p1198_p10 = pnand %p1197_p8, %p1193_p9 }
  0x4b   : > { %1201 = shalt.err (!%p1198_p10)
}
  0x4c   : > { %s1691_s14 = smov 4   ;;  %s1692_s15 = smov 64  }
  0x4d   : > { %1033 = dma.hbm_to_vmem [thread:$0]  (!%p1384_p13), %s1422_s17, 512, %s1420_s18, %s1396_s26, %s1692_s15, %s1692_s15, %s1691_s14  }
  0x4e   : > { %284 = sbr.rel (%p1428_p2) target bundleno = 590 (0x24e), region = 44  ;;  %s1468_s28 = sand.u32 (!%p1428_p2), 1, %s1279_s22  }
  0x4f   : > { %s936_s29 = sshll.u32 (!%p1428_p2), %s1468_s28, 3  ;;  %s287_s13 = scalar_lea.sflag (!%p1428_p2), [#allocation3], %s1468_s28 }
  0x50   : > { %s1474_s11 = scalar_lea.vmem (!%p1428_p2), [#allocation2], %s936_s29 }
  0x53   : > { %1262 = dma.done.wait (%p1366_p6), %s287_s13, 128  }
  0x54   : > { %1264 = vsyncadd (%p1366_p6), %s287_s13, 4294967168  ;;  %s296_s26 = sand.u32 1, %s1348_s25   ;;  %s937_s18 = sshll.u32 %s1468_s28, 5 }
  0x55   : > { %s297_s17 = scalar_lea.sflag [#allocation6], %s296_s26  ;;  %s1484_s19 = scalar_lea.vmem [#allocation5], %s937_s18 }
  0x56   : > { %1266 = dma.done.wait (%p1366_p6), %s297_s17, 1024  }
  0x57   : > { %1268 = vsyncadd (%p1366_p6), %s297_s17, 4294966272  ;;  %v400_v0 = vld [vmem:[%s1666_s3 + $0x78] sm:$0xff]  ;;  %v399_v1 = vld [vmem:[%s1666_s3 + $0x70] sm:$0xff]  ;;  %s310_s20 = scalar_lea.vmem [#allocation7], %s937_s18  ;;  %vm522_vm0 = vcmask 7168   ;;  %vm779_vm1 = vcmask 1041409  }
  0x58   : > { %405 = vmatpush.msra.mxu0 %v400_v0  ;;  %v398_v2 = vld [vmem:[%s1666_s3 + $0x68] sm:$0xff]  ;;  %v397_v3 = vld [vmem:[%s1666_s3 + $0x60] sm:$0xff]  ;;  %v480_v4 = vld [vmem:[%s1668_s5 + $0x78] sm:$0xff]  ;;  %vm781_vm2 = vcmask 1042434   ;;  %vm783_vm3 = vcmask 1043459   ;;  %vm785_vm4 = vcmask 1044484  }
  0x59   : > { %v396_v5 = vld [vmem:[%s1666_s3 + $0x58] sm:$0xff]  ;;  %481 = vmatpush.msra.mxu1 %v480_v4  ;;  %984 = vmatpush.msra.mxu2 %v480_v4  ;;  %v479_v6 = vld [vmem:[%s1668_s5 + $0x70] sm:$0xff]  ;;  %v478_v7 = vld [vmem:[%s1668_s5 + $0x68] sm:$0xff]  ;;  %s941_s18 = sshll.u32 %s1348_s25, 3  ;;  %vm787_vm5 = vcmask 1045509   ;;  %vm789_vm6 = vcmask 1046534  }
  0x5a   : > { %406 = vmatpush.msra.mxu0 %v399_v1  ;;  %985 = vmatpush.msra.mxu3 %v480_v4  ;;  %v395_v8 = vld [vmem:[%s1666_s3 + $0x50] sm:$0xff]  ;;  %v477_v9 = vld [vmem:[%s1668_s5 + $0x60] sm:$0xff]  ;;  %v394_v10 = vld [vmem:[%s1666_s3 + $0x48] sm:$0xff]  ;;  %s806_s1 = scalar_lea.hbm %s1669_s6, %s941_s18  ;;  %s349_s10 = scalar_lea.vmem [#allocation8], %s936_s29  ;;  %vm791_vm7 = vcmask 1047559  }
  0x5b   : > { %482 = vmatpush.msra.mxu1 %v479_v6  ;;  %986 = vmatpush.msra.mxu2 %v479_v6  ;;  %v476_v11 = vld [vmem:[%s1668_s5 + $0x58] sm:$0xff]  ;;  %v393_v12 = vld [vmem:[%s1666_s3 + $0x40] sm:$0xff]  ;;  %v475_v13 = vld [vmem:[%s1668_s5 + $0x50] sm:$0xff]  ;;  %s808_s24 = sshll.u32 %s349_s10, 4  ;;  %s810_s25 = sshll.u32 %s806_s1, 4  ;;  %s809_s24 = int_to_ptr.vmem [resolvable:$true] %s808_s24  ;;  %s811_s25 = int_to_ptr.hbm [resolvable:$true] %s810_s25 }
  0x5c   : > { %407 = vmatpush.msra.mxu0 %v398_v2  ;;  %987 = vmatpush.msra.mxu3 %v479_v6  ;;  %v392_v14 = vld [vmem:[%s1666_s3 + $0x38] sm:$0xff]  ;;  %v474_v15 = vld [vmem:[%s1668_s5 + $0x48] sm:$0xff]  ;;  %v391_v16 = vld [vmem:[%s1666_s3 + $0x30] sm:$0xff]  ;;  %s796_s27 = scalar_lea.sflag [#allocation4], %s1468_s28  ;;  %s1231_s30 = sshra.s32 %s811_s25, 4  ;;  %s1232_s30 = int_to_ptr.hbm [resolvable:$true] %s1231_s30 }
  0x5d   : > { %483 = vmatpush.msra.mxu1 %v478_v7  ;;  %988 = vmatpush.msra.mxu2 %v478_v7  ;;  %v473_v17 = vld [vmem:[%s1668_s5 + $0x40] sm:$0xff]  ;;  %v390_v18 = vld [vmem:[%s1666_s3 + $0x28] sm:$0xff]  ;;  %v472_v19 = vld [vmem:[%s1668_s5 + $0x38] sm:$0xff]  ;;  %s1237_s9 = scalar_lea.hbm %s1669_s6, 16  ;;  %p1238_p1 = scmp.lt.s32.totalorder %s1232_s30, %s1669_s6 }
  0x5e   : > { %408 = vmatpush.msra.mxu0 %v397_v3  ;;  %989 = vmatpush.msra.mxu3 %v478_v7  ;;  %v389_v20 = vld [vmem:[%s1666_s3 + $0x20] sm:$0xff]  ;;  %v388_v21 = vld [vmem:[%s1666_s3 + $0x18] sm:$0xff]  ;;  %v387_v22 = vld [vmem:[%s1666_s3 + $0x10] sm:$0xff] }
  0x5f   : > { %484 = vmatpush.msra.mxu1 %v477_v9  ;;  %990 = vmatpush.msra.mxu2 %v477_v9  ;;  %v386_v23 = vld [vmem:[%s1666_s3 + $0x8] sm:$0xff]  ;;  %v385_v24 = vld [vmem:[%s1666_s3] sm:$0xff]  ;;  %v471_v26 = vld [vmem:[%s1668_s5 + $0x30] sm:$0xff] }
  0x60   : > { %409 = vmatpush.msra.mxu0 %v396_v5  ;;  %991 = vmatpush.msra.mxu3 %v477_v9  ;;  %v352_v25 = vld [vmem:[%s1474_s11] sm:$0xff]  ;;  %v468_v29 = vld [vmem:[%s1668_s5 + $0x18] sm:$0xff]  ;;  %v467_v30 = vld [vmem:[%s1668_s5 + $0x10] sm:$0xff]  ;;  %s1233_s11 = scalar_lea.hbm %s1232_s30, 8 }
  0x61   : > { %485 = vmatpush.msra.mxu1 %v476_v11  ;;  %992 = vmatpush.msra.mxu2 %v476_v11  ;;  %v470_v27 = vld [vmem:[%s1668_s5 + $0x28] sm:$0xff]  ;;  %v469_v28 = vld [vmem:[%s1668_s5 + $0x20] sm:$0xff]  ;;  %v963_v34 = vld [vmem:[%s310_s20] sm:$0xff]   ;;  %p1234_p6 = scmp.ne.s32.totalorder %s1232_s30, %s1233_s11  ;;  %p1239_p2 = scmp.lt.s32.totalorder %s1237_s9, %s1233_s11 }
  0x62   : > { %410 = vmatpush.msra.mxu0 %v395_v8  ;;  %993 = vmatpush.msra.mxu3 %v476_v11  ;;  %v466_v31 = vld [vmem:[%s1668_s5 + $0x8] sm:$0xff]  ;;  %v465_v32 = vld [vmem:[%s1668_s5] sm:$0xff]  ;;  %v981_v35 = vld [vmem:[%s310_s20 + $0x8] sm:$0xff]   ;;  %v964_v39 = vunpack.c.l.bf16 %v963_v34  ;;  %v965_v50 = vunpack.c.h.bf16 %v963_v34 }
  0x63   : > { %486 = vmatpush.msra.mxu1 %v475_v13  ;;  %994 = vmatpush.msra.mxu2 %v475_v13  ;;  %v1078_v33 = vld [vmem:[%s1667_s4] ss:$0 sm:$0xff]  ;;  %v968_v40 = vunpack.c.l.bf16 %v981_v35  ;;  %v983_v55 = vld [vmem:[%s310_s20 + $0x18] sm:$0xff]   ;;  %v969_v56 = vunpack.c.h.bf16 %v981_v35  ;;  %p1235_p9 = pnand %p1234_p6, %p1373_p11  ;;  %p1240_p0 = por %p1239_p2, %p1238_p1 }
  0x64   : > { %411 = vmatpush.msra.mxu0 %v394_v10  ;;  %995 = vmatpush.msra.mxu3 %v475_v13  ;;  %v982_v36 = vld [vmem:[%s310_s20 + $0x10] sm:$0xff]   ;;  %v976_v58 = vunpack.c.l.bf16 %v983_v55  ;;  %v977_v6 = vunpack.c.h.bf16 %v983_v55  ;;  %v1291_v55 = vmov 0  }
  0x65   : > { %487 = vmatpush.msra.mxu1 %v474_v15  ;;  %996 = vmatpush.msra.mxu2 %v474_v15  ;;  %v973_v41 = vunpack.c.h.bf16 %v982_v36  ;;  %v972_v4 = vunpack.c.l.bf16 %v982_v36  ;;  %p1236_p13 = pneg %p1235_p9 }
  0x66   : > { %412 = vmatpush.msra.mxu0 %v393_v12  ;;  %997 = vmatpush.msra.mxu3 %v474_v15 }
  0x67   : > { %488 = vmatpush.msra.mxu1 %v473_v17  ;;  %998 = vmatpush.msra.mxu2 %v473_v17  ;;  %p1241_p3 = pnand %p1240_p0, %p1236_p13 }
  0x68   : > { %413 = vmatpush.msra.mxu0 %v392_v14  ;;  %999 = vmatpush.msra.mxu3 %v473_v17 }
  0x69   : > { %489 = vmatpush.msra.mxu1 %v472_v19  ;;  %1000 = vmatpush.msra.mxu2 %v472_v19 }
  0x6a   : > { %414 = vmatpush.msra.mxu0 %v391_v16  ;;  %1001 = vmatpush.msra.mxu3 %v472_v19 }
  0x6b   : > { %490 = vmatpush.msra.mxu1 %v471_v26  ;;  %1002 = vmatpush.msra.mxu2 %v471_v26 }
  0x6c   : > { %415 = vmatpush.msra.mxu0 %v390_v18  ;;  %1003 = vmatpush.msra.mxu3 %v471_v26 }
  0x6d   : > { %491 = vmatpush.msra.mxu1 %v470_v27  ;;  %1004 = vmatpush.msra.mxu2 %v470_v27 }
  0x6e   : > { %416 = vmatpush.msra.mxu0 %v389_v20  ;;  %1005 = vmatpush.msra.mxu3 %v470_v27 }
  0x6f   : > { %492 = vmatpush.msra.mxu1 %v469_v28  ;;  %1006 = vmatpush.msra.mxu2 %v469_v28 }
  0x70   : > { %417 = vmatpush.msra.mxu0 %v388_v21  ;;  %1007 = vmatpush.msra.mxu3 %v469_v28 }
  0x71   : > { %493 = vmatpush.msra.mxu1 %v468_v29  ;;  %1008 = vmatpush.msra.mxu2 %v468_v29 }
  0x72   : > { %418 = vmatpush.msra.mxu0 %v387_v22  ;;  %1009 = vmatpush.msra.mxu3 %v468_v29 }
  0x73   : > { %494 = vmatpush.msra.mxu1 %v467_v30  ;;  %1010 = vmatpush.msra.mxu2 %v467_v30 }
  0x74   : > { %419 = vmatpush.msra.mxu0 %v386_v23  ;;  %1011 = vmatpush.msra.mxu3 %v467_v30 }
  0x75   : > { %495 = vmatpush.msra.mxu1 %v466_v31  ;;  %1012 = vmatpush.msra.mxu2 %v466_v31 }
  0x76   : > { %420 = vmatpush.msra.mxu0 %v385_v24  ;;  %1013 = vmatpush.msra.mxu3 %v466_v31 }
  0x77   : > { %421 = vmatmul.f32.vlgmr.msra.gmra.mxu0 %v352_v25  ;;  %496 = vmatpush.msra.mxu1 %v465_v32 }
  0x78   : > { %1014 = vmatpush.msra.mxu2 %v465_v32  ;;  %1015 = vmatpush.msra.mxu3 %v465_v32 }
  0x79   : > { %1075 = vset.pattern.permute.xlu0 %v1291_v55  ;;  %1076 = vset.pattern.permute.xlu1 %v1291_v55 }
  0x7a   : > { %1077 = vset.pattern.permute.xlu2 %v1291_v55 }
  0xf4   : > { %v422_v37 = vpop.f32.mrf.mxu0 }
  0xf5   : > { %v423_v38 = vadd.f32 %v1078_v33, %v422_v37 }
  0xf7   : > { %v433_v42 = vperm.slane %v423_v38, 0  ;;  %v427_v43 = vrot.slane %v423_v38, 2  ;;  %v430_v44 = vrot.slane %v423_v38, 5  ;;  %v426_v45 = vrot.slane %v423_v38, 1 }
  0xf8   : > { %v428_v49 = vrot.slane %v423_v38, 3  ;;  %v431_v51 = vrot.slane %v423_v38, 6  ;;  %v429_v63 = vrot.slane %v423_v38, 4  ;;  %v432_v1 = vrot.slane %v423_v38, 7 }
  0xf9   : > { %v449_v46 = vadd.f32 %v964_v39, %v433_v42  ;;  %v435_v47 = vperm.slane %v427_v43, 0  ;;  %v438_v48 = vperm.slane %v430_v44, 0  ;;  %v434_v54 = vperm.slane %v426_v45, 0 }
  0xfa   : > { %v436_v57 = vperm.slane %v428_v49, 0  ;;  %v439_v59 = vperm.slane %v431_v51, 0  ;;  %v437_v5 = vperm.slane %v429_v63, 0  ;;  %v440_v7 = vperm.slane %v432_v1, 0 }
  0xfb   : > { %1079 = vtanh.f32 %v449_v46  ;;  %v451_v52 = vadd.f32 %v968_v40, %v435_v47  ;;  %v454_v53 = vadd.f32 %v973_v41, %v438_v48  ;;  %v450_v60 = vadd.f32 %v965_v50, %v434_v54 }
  0xfc   : > { %v452_v62 = vadd.f32 %v969_v56, %v436_v57  ;;  %v455_v0 = vadd.f32 %v976_v58, %v439_v59  ;;  %v453_v9 = vadd.f32 %v972_v4, %v437_v5  ;;  %v456_v10 = vadd.f32 %v977_v6, %v440_v7 }
  0xfd   : > { %1081 = vtanh.f32 %v451_v52 }
  0xfe   : > { %1083 = vtanh.f32 %v454_v53 }
  0xff   : > { %1085 = vtanh.f32 %v450_v60 }
 0x100   : > { %1087 = vtanh.f32 %v452_v62 }
 0x101   : > { %v1080_v61 = vpop.eup %1079  ;;  %1089 = vtanh.f32 %v455_v0 }
 0x102   : > { %497 = vmatmul.f32.vlgmr.msra.gmra.mxu1 %v1080_v61  ;;  %1091 = vtanh.f32 %v453_v9 }
 0x103   : > { %v1082_v2 = vpop.eup %1081  ;;  %1093 = vtanh.f32 %v456_v10 }
 0x104   : > { %v1084_v3 = vpop.eup %1083  ;;  %503 = vmatmul.f32.vlgmr.msra.gmra.mxu2 %v1082_v2 }
 0x105   : > { %512 = vmatmul.f32.vlgmr.msra.gmra.mxu3 %v1084_v3  ;;  %v1086_v8 = vpop.eup %1085 }
 0x106   : > { %v1088_v11 = vpop.eup %1087 }
 0x107   : > { %v1090_v12 = vpop.eup %1089 }
 0x108   : > { %v1092_v13 = vpop.eup %1091 }
 0x109   : > { %v1094_v14 = vpop.eup %1093 }
 0x10a   : > { %500 = vmatmul.f32.gmra.mxu1 %v1086_v8 }
 0x10c   : > { %506 = vmatmul.f32.gmra.mxu2 %v1088_v11 }
 0x10d   : > { %515 = vmatmul.f32.gmra.mxu3 %v1090_v12 }
 0x114   : > { %509 = vmatmul.f32.gmra.mxu2 %v1092_v13 }
 0x115   : > { %518 = vmatmul.f32.gmra.mxu3 %v1094_v14 }
 0x17f   : > { %v498_v15 = vpop.f32.mrf.mxu1 }
 0x180   : > { %v523_v16 = vsel %vm522_vm0, %v498_v15, -inf }
 0x181   : > { %v524_v17 = vrot.slane %v523_v16, 4 }
 0x183   : > { %v525_v18 = vmax.f32 %v523_v16, %v524_v17 }
 0x185   : > { %v526_v19 = vrot.slane %v525_v18, 2 }
 0x187   : > { %v527_v20 = vmax.f32 %v525_v18, %v526_v19  ;;  %v501_v21 = vpop.f32.mrf.mxu1  ;;  %v504_v22 = vpop.f32.mrf.mxu2 }
 0x188   : > { %v530_v23 = vsel %vm522_vm0, %v501_v21, -inf  ;;  %v537_v24 = vsel %vm522_vm0, %v504_v22, -inf  ;;  %v513_v25 = vpop.f32.mrf.mxu3 }
 0x189   : > { %v528_v26 = vrot.slane %v527_v20, 1  ;;  %v531_v27 = vrot.slane %v530_v23, 4  ;;  %v538_v28 = vrot.slane %v537_v24, 4  ;;  %v558_v29 = vsel %vm522_vm0, %v513_v25, -inf }
 0x18a   : > { %v559_v30 = vrot.slane %v558_v29, 4 }
 0x18b   : > { %v529_v31 = vmax.f32 %v527_v20, %v528_v26  ;;  %v532_v32 = vmax.f32 %v530_v23, %v531_v27  ;;  %v539_v33 = vmax.f32 %v537_v24, %v538_v28 }
 0x18c   : > { %v560_v34 = vmax.f32 %v558_v29, %v559_v30 }
 0x18d   : > { %v579_v35 = vsub.f32 %v498_v15, %v529_v31  ;;  %v533_v36 = vrot.slane %v532_v32, 2  ;;  %v540_v37 = vrot.slane %v539_v33, 2 }
 0x18e   : > { %v561_v38 = vrot.slane %v560_v34, 2 }
 0x18f   : > { %v587_v39 = vmul.f32 1.442695, %v579_v35  ;;  %v534_v40 = vmax.f32 %v532_v32, %v533_v36  ;;  %v541_v41 = vmax.f32 %v539_v33, %v540_v37  ;;  %v507_v42 = vpop.f32.mrf.mxu2 }
 0x190   : > { %v562_v43 = vmax.f32 %v560_v34, %v561_v38  ;;  %v544_v44 = vsel %vm522_vm0, %v507_v42, -inf  ;;  %v516_v45 = vpop.f32.mrf.mxu3 }
 0x191   : > { %1095 = vpow2.f32 %v587_v39  ;;  %v535_v46 = vrot.slane %v534_v40, 1  ;;  %v542_v47 = vrot.slane %v541_v41, 1  ;;  %v545_v48 = vrot.slane %v544_v44, 4 }
 0x192   : > { %v563_v49 = vrot.slane %v562_v43, 1  ;;  %v565_v50 = vsel %vm522_vm0, %v516_v45, -inf }
 0x193   : > { %v536_v51 = vmax.f32 %v534_v40, %v535_v46  ;;  %v543_v52 = vmax.f32 %v541_v41, %v542_v47  ;;  %v546_v53 = vmax.f32 %v544_v44, %v545_v48  ;;  %v566_v54 = vrot.slane %v565_v50, 4 }
 0x194   : > { %v564_v56 = vmax.f32 %v562_v43, %v563_v49 }
 0x195   : > { %v580_v57 = vsub.f32 %v501_v21, %v536_v51  ;;  %v581_v58 = vsub.f32 %v504_v22, %v543_v52  ;;  %v547_v59 = vrot.slane %v546_v53, 2  ;;  %v567_v60 = vmax.f32 %v565_v50, %v566_v54 }
 0x196   : > { %v584_v4 = vsub.f32 %v513_v25, %v564_v56 }
 0x197   : > { %v1598_v61 = vpop.eup %1095  ;;  %v589_v62 = vmul.f32 1.442695, %v580_v57  ;;  %v591_v63 = vmul.f32 1.442695, %v581_v58  ;;  %v548_v0 = vmax.f32 %v546_v53, %v547_v59  ;;  %v568_v1 = vrot.slane %v567_v60, 2  ;;  %v510_v2 = vpop.f32.mrf.mxu2 }
 0x198   : > { %v603_v3 = vsel %vm522_vm0, %v1598_v61, 0.0  ;;  %v551_v5 = vsel %vm522_vm0, %v510_v2, -inf  ;;  %v519_v6 = vpop.f32.mrf.mxu3  ;;  %v597_v15 = vmul.f32 1.442695, %v584_v4 }
 0x199   : > { %v604_v7 = vrot.slane %v603_v3, 4  ;;  %1097 = vpow2.f32 %v589_v62  ;;  %v549_v8 = vrot.slane %v548_v0, 1  ;;  %v569_v9 = vmax.f32 %v567_v60, %v568_v1 }
 0x19a   : > { %1099 = vpow2.f32 %v591_v63  ;;  %v552_v10 = vrot.slane %v551_v5, 4  ;;  %v572_v11 = vsel %vm522_vm0, %v519_v6, -inf }
 0x19b   : > { %v605_v12 = vadd.f32 %v604_v7, %v603_v3  ;;  %v550_v13 = vmax.f32 %v548_v0, %v549_v8  ;;  %v570_v14 = vrot.slane %v569_v9, 1  ;;  %v573_v17 = vrot.slane %v572_v11, 4 }
 0x19c   : > { %v553_v16 = vmax.f32 %v551_v5, %v552_v10  ;;  %1101 = vpow2.f32 %v597_v15 }
 0x19d   : > { %v606_v18 = vrot.slane %v605_v12, 2  ;;  %v582_v19 = vsub.f32 %v507_v42, %v550_v13  ;;  %v571_v20 = vmax.f32 %v569_v9, %v570_v14  ;;  %v574_v22 = vmax.f32 %v572_v11, %v573_v17 }
 0x19e   : > { %v554_v21 = vrot.slane %v553_v16, 2 }
 0x19f   : > { %v1604_v23 = vpop.eup %1097  ;;  %v593_v24 = vmul.f32 1.442695, %v582_v19  ;;  %v585_v25 = vsub.f32 %v516_v45, %v571_v20  ;;  %v607_v26 = vadd.f32 %v606_v18, %v605_v12  ;;  %v575_v30 = vrot.slane %v574_v22, 2 }
 0x1a0   : > { %v1606_v27 = vpop.eup %1099  ;;  %v610_v28 = vsel %vm522_vm0, %v1604_v23, 0.0  ;;  %v555_v29 = vmax.f32 %v553_v16, %v554_v21 }
 0x1a1   : > { %v611_v31 = vrot.slane %v610_v28, 4  ;;  %v617_v32 = vsel %vm522_vm0, %v1606_v27, 0.0  ;;  %1103 = vpow2.f32 %v593_v24  ;;  %v599_v33 = vmul.f32 1.442695, %v585_v25 }
 0x1a2   : > { %v618_v34 = vrot.slane %v617_v32, 4  ;;  %v556_v35 = vrot.slane %v555_v29, 1  ;;  %v576_v36 = vmax.f32 %v574_v22, %v575_v30  ;;  %v608_v38 = vrot.slane %v607_v26, 1  ;;  %v1612_v44 = vpop.eup %1101 }
 0x1a3   : > { %v612_v37 = vadd.f32 %v611_v31, %v610_v28  ;;  %1105 = vpow2.f32 %v599_v33  ;;  %v638_v55 = vsel %vm522_vm0, %v1612_v44, 0.0 }
 0x1a4   : > { %v619_v39 = vadd.f32 %v618_v34, %v617_v32  ;;  %v557_v40 = vmax.f32 %v555_v29, %v556_v35  ;;  %v577_v41 = vrot.slane %v576_v36, 1  ;;  %v609_v43 = vadd.f32 %v608_v38, %v607_v26 }
 0x1a5   : > { %v613_v42 = vrot.slane %v612_v37, 2  ;;  %v639_v1 = vrot.slane %v638_v55, 4 }
 0x1a6   : > { %v620_v45 = vrot.slane %v619_v39, 2  ;;  %v583_v46 = vsub.f32 %v510_v2, %v557_v40  ;;  %v578_v47 = vmax.f32 %v576_v36, %v577_v41  ;;  %1107 = vrcp.f32 %v609_v43 }
 0x1a7   : > { %v1104_v48 = vpop.eup %1103  ;;  %v614_v49 = vadd.f32 %v613_v42, %v612_v37  ;;  %v640_v10 = vadd.f32 %v639_v1, %v638_v55  ;;  %v978_v55 = vld [vmem:[%s1484_s19 + $0x8] sm:$0xff]  }
 0x1a8   : > { %v624_v50 = vsel %vm522_vm0, %v1104_v48, 0.0  ;;  %v595_v51 = vmul.f32 1.442695, %v583_v46  ;;  %v586_v52 = vsub.f32 %v519_v6, %v578_v47  ;;  %v621_v53 = vadd.f32 %v620_v45, %v619_v39 }
 0x1a9   : > { %v1106_v54 = vpop.eup %1105  ;;  %v625_v56 = vrot.slane %v624_v50, 4  ;;  %v615_v57 = vrot.slane %v614_v49, 1  ;;  %v641_v21 = vrot.slane %v640_v10, 2 }
 0x1aa   : > { %v645_v58 = vsel %vm522_vm0, %v1106_v54, 0.0  ;;  %1109 = vpow2.f32 %v595_v51  ;;  %v601_v59 = vmul.f32 1.442695, %v586_v52  ;;  %v622_v60 = vrot.slane %v621_v53, 1 }
 0x1ab   : > { %v626_v62 = vadd.f32 %v625_v56, %v624_v50  ;;  %v646_v63 = vrot.slane %v645_v58, 4  ;;  %v616_v0 = vadd.f32 %v615_v57, %v614_v49  ;;  %v642_v30 = vadd.f32 %v641_v21, %v640_v10  ;;  %v947_v49 = vld [vmem:[%s1484_s19] sm:$0xff]  }
 0x1ac   : > { %1111 = vpow2.f32 %v601_v59  ;;  %v623_v2 = vadd.f32 %v622_v60, %v621_v53  ;;  %v1108_v3 = vpop.eup %1107  ;;  %v948_v50 = vunpack.c.l.bf16 %v947_v49  ;;  %v979_v53 = vld [vmem:[%s1484_s19 + $0x10] sm:$0xff]   ;;  %v949_v59 = vunpack.c.h.bf16 %v947_v49 }
 0x1ad   : > { %v627_v4 = vrot.slane %v626_v62, 2  ;;  %v647_v5 = vadd.f32 %v646_v63, %v645_v58  ;;  %1113 = vrcp.f32 %v616_v0  ;;  %v667_v6 = vmul.f32 %v1108_v3, %v1598_v61 }
 0x1ae   : > { %1115 = vrcp.f32 %v623_v2  ;;  %v643_v39 = vrot.slane %v642_v30, 1  ;;  %v956_v56 = vunpack.c.l.bf16 %v979_v53  ;;  %v952_v58 = vunpack.c.l.bf16 %v978_v55 }
 0x1af   : > { %v628_v7 = vadd.f32 %v627_v4, %v626_v62  ;;  %v648_v8 = vrot.slane %v647_v5, 2  ;;  %677 = vperm.xlu0 %1075, %v667_v6   ;;  %v957_v60 = vunpack.c.h.bf16 %v979_v53  ;;  %v980_v6 = vld [vmem:[%s1484_s19 + $0x18] sm:$0xff]  }
 0x1b0   : > { %v1110_v9 = vpop.eup %1109  ;;  %v644_v41 = vadd.f32 %v643_v39, %v642_v30 }
 0x1b1   : > { %v649_v11 = vadd.f32 %v648_v8, %v647_v5  ;;  %v631_v12 = vsel %vm522_vm0, %v1110_v9, 0.0  ;;  %v629_v13 = vrot.slane %v628_v7, 1 }
 0x1b2   : > { %v1112_v14 = vpop.eup %1111  ;;  %v632_v15 = vrot.slane %v631_v12, 4 }
 0x1b3   : > { %v1114_v16 = vpop.eup %1113  ;;  %v652_v17 = vsel %vm522_vm0, %v1112_v14, 0.0  ;;  %v630_v18 = vadd.f32 %v629_v13, %v628_v7  ;;  %v650_v19 = vrot.slane %v649_v11, 1  ;;  %v960_v13 = vunpack.c.l.bf16 %v980_v6 }
 0x1b4   : > { %v1116_v20 = vpop.eup %1115  ;;  %v633_v61 = vadd.f32 %v632_v15, %v631_v12  ;;  %v653_v22 = vrot.slane %v652_v17, 4  ;;  %v668_v24 = vmul.f32 %v1114_v16, %v1604_v23 }
 0x1b5   : > { %v669_v25 = vmul.f32 %v1116_v20, %v1606_v27  ;;  %1117 = vrcp.f32 %v630_v18  ;;  %v651_v26 = vadd.f32 %v650_v19, %v649_v11  ;;  %v953_v11 = vunpack.c.h.bf16 %v978_v55 }
 0x1b6   : > { %v634_v28 = vrot.slane %v633_v61, 2  ;;  %v654_v29 = vadd.f32 %v653_v22, %v652_v17 }
 0x1b7   : > { %687 = vperm.xlu1 %1076, %v669_v25   ;;  %1119 = vrcp.f32 %v651_v26  ;;  %682 = vperm.xlu0 %1075, %v668_v24  }
 0x1b8   : > { %v655_v31 = vrot.slane %v654_v29, 2  ;;  %v635_v32 = vadd.f32 %v634_v28, %v633_v61 }
 0x1ba   : > { %v656_v33 = vadd.f32 %v655_v31, %v654_v29  ;;  %v636_v34 = vrot.slane %v635_v32, 1 }
 0x1bb   : > { %v1118_v35 = vpop.eup %1117 }
 0x1bc   : > { %v670_v36 = vmul.f32 %v1118_v35, %v1104_v48  ;;  %v657_v37 = vrot.slane %v656_v33, 1  ;;  %v637_v38 = vadd.f32 %v636_v34, %v635_v32 }
 0x1bd   : > { %v1120_v23 = vpop.eup %1119 }
 0x1be   : > { %v673_v40 = vmul.f32 %v1120_v23, %v1106_v54  ;;  %v658_v27 = vadd.f32 %v657_v37, %v656_v33  ;;  %1121 = vrcp.f32 %v637_v38  ;;  %v961_v38 = vunpack.c.h.bf16 %v980_v6 }
 0x1bf   : > { %692 = vperm.xlu1 %1076, %v670_v36  }
 0x1c0   : > { %707 = vperm.xlu0 %1075, %v673_v40   ;;  %1123 = vrcp.f32 %v658_v27 }
 0x1c1   : > { %1125 = vrcp.f32 %v644_v41 }
 0x1c4   : > { %v1122_v42 = vpop.eup %1121 }
 0x1c5   : > { %v671_v43 = vmul.f32 %v1122_v42, %v1110_v9 }
 0x1c6   : > { %v1124_v45 = vpop.eup %1123 }
 0x1c7   : > { %v674_v46 = vmul.f32 %v1124_v45, %v1112_v14  ;;  %697 = vperm.xlu2 %1077, %v671_v43   ;;  %v1126_v47 = vpop.eup %1125 }
 0x1c8   : > { %v672_v48 = vmul.f32 %v1126_v47, %v1612_v44 }
 0x1c9   : > { %712 = vperm.xlu1 %1076, %v674_v46  }
 0x1cf   : > { %702 = vperm.xlu2 %1077, %v672_v48  }
 0x221   : > { %v698_v51 = vpop.permute.xlu2 %697  ;;  %v678_v52 = vpop.permute.xlu0 %677 }
 0x222   : > { %v715_v54 = vmul.f32 %v948_v50, %v678_v52  ;;  %v719_v62 = vmul.f32 %v956_v56, %v698_v51 }
 0x224   : > { %v723_v57 = vrot.slane %v715_v54, 4  ;;  %v747_v7 = vrot.slane %v719_v62, 4 }
 0x226   : > { %v724_v1 = vadd.f32 %v723_v57, %v715_v54  ;;  %v748_v16 = vadd.f32 %v747_v7, %v719_v62 }
 0x228   : > { %v725_v9 = vrot.slane %v724_v1, 2  ;;  %v749_v28 = vrot.slane %v748_v16, 2 }
 0x229   : > { %v688_v63 = vpop.permute.xlu1 %687  ;;  %v703_v0 = vpop.permute.xlu2 %702 }
 0x22a   : > { %v717_v2 = vmul.f32 %v952_v58, %v688_v63  ;;  %v683_v44 = vpop.permute.xlu0 %682  ;;  %v720_v5 = vmul.f32 %v957_v60, %v703_v0  ;;  %v726_v19 = vadd.f32 %v725_v9, %v724_v1  ;;  %v750_v39 = vadd.f32 %v749_v28, %v748_v16 }
 0x22b   : > { %v716_v3 = vmul.f32 %v949_v59, %v683_v44 }
 0x22c   : > { %v735_v4 = vrot.slane %v717_v2, 4  ;;  %v753_v15 = vrot.slane %v720_v5, 4  ;;  %v727_v31 = vrot.slane %v726_v19, 1  ;;  %v751_v48 = vrot.slane %v750_v39, 1 }
 0x22d   : > { %v729_v8 = vrot.slane %v716_v3, 4 }
 0x22e   : > { %v736_v10 = vadd.f32 %v735_v4, %v717_v2  ;;  %v754_v25 = vadd.f32 %v753_v15, %v720_v5  ;;  %v728_v23 = vadd.f32 %v727_v31, %v726_v19  ;;  %v752_v56 = vadd.f32 %v751_v48, %v750_v39 }
 0x22f   : > { %v730_v12 = vadd.f32 %v729_v8, %v716_v3 }
 0x230   : > { %v737_v14 = vrot.slane %v736_v10, 2  ;;  %v755_v35 = vrot.slane %v754_v25, 2 }
 0x231   : > { %v731_v17 = vrot.slane %v730_v12, 2  ;;  %v693_v18 = vpop.permute.xlu1 %692 }
 0x232   : > { %v718_v20 = vmul.f32 %v953_v11, %v693_v18  ;;  %v708_v21 = vpop.permute.xlu0 %707  ;;  %v738_v61 = vadd.f32 %v737_v14, %v736_v10  ;;  %v756_v43 = vadd.f32 %v755_v35, %v754_v25 }
 0x233   : > { %v732_v22 = vadd.f32 %v731_v17, %v730_v12  ;;  %v721_v24 = vmul.f32 %v960_v13, %v708_v21 }
 0x234   : > { %v741_v26 = vrot.slane %v718_v20, 4  ;;  %v739_v33 = vrot.slane %v738_v61, 1  ;;  %v757_v53 = vrot.slane %v756_v43, 1 }
 0x235   : > { %v733_v29 = vrot.slane %v732_v22, 1  ;;  %v759_v30 = vrot.slane %v721_v24, 4 }
 0x236   : > { %v742_v32 = vadd.f32 %v741_v26, %v718_v20  ;;  %v740_v27 = vadd.f32 %v739_v33, %v738_v61  ;;  %v758_v60 = vadd.f32 %v757_v53, %v756_v43 }
 0x237   : > { %v760_v34 = vadd.f32 %v759_v30, %v721_v24  ;;  %v734_v36 = vadd.f32 %v733_v29, %v732_v22 }
 0x238   : > { %v743_v37 = vrot.slane %v742_v32, 2 }
 0x239   : > { %v761_v41 = vrot.slane %v760_v34, 2  ;;  %v780_v45 = vsel %vm779_vm1, %v734_v36, %v728_v23 }
 0x23a   : > { %v744_v40 = vadd.f32 %v743_v37, %v742_v32  ;;  %v782_v51 = vsel %vm781_vm2, %v740_v27, %v780_v45 }
 0x23b   : > { %v713_v42 = vpop.permute.xlu1 %712  ;;  %v762_v52 = vadd.f32 %v761_v41, %v760_v34 }
 0x23c   : > { %v745_v46 = vrot.slane %v744_v40, 1  ;;  %v722_v47 = vmul.f32 %v961_v38, %v713_v42 }
 0x23d   : > { %v763_v59 = vrot.slane %v762_v52, 1 }
 0x23e   : > { %v746_v49 = vadd.f32 %v745_v46, %v744_v40  ;;  %v765_v50 = vrot.slane %v722_v47, 4 }
 0x23f   : > { %v764_v1 = vadd.f32 %v763_v59, %v762_v52 }
 0x240   : > { %v784_v54 = vsel %vm783_vm3, %v746_v49, %v782_v51  ;;  %v766_v55 = vadd.f32 %v765_v50, %v722_v47 }
 0x241   : > { %v786_v58 = vsel %vm785_vm4, %v752_v56, %v784_v54 }
 0x242   : > { %v767_v57 = vrot.slane %v766_v55, 2  ;;  %v788_v0 = vsel %vm787_vm5, %v758_v60, %v786_v58 }
 0x243   : > { %v790_v44 = vsel %vm789_vm6, %v764_v1, %v788_v0 }
 0x244   : > { %v768_v62 = vadd.f32 %v767_v57, %v766_v55 }
 0x246   : > { %v769_v63 = vrot.slane %v768_v62, 1 }
 0x248   : > { %v770_v2 = vadd.f32 %v769_v63, %v768_v62 }
 0x24a   : > { %v792_v3 = vsel %vm791_vm7, %v770_v2, %v790_v44 }
 0x24b   : > { %794 = vst [vmem:[%s349_s10] sm:$0xff] %v792_v3 }
 0x24c   : > { %1244 = shalt.err (!%p1241_p3)
}
 0x24d   : > { %1022 = dma.vmem_to_hbm [thread:$0]  (%p1373_p11), %s809_s24, 128, %s811_s25, %s796_s27  }
 0x24e PF: > { %s1694_s15 = sld [smem:[#allocation13_spill]]  ;;  %s822_s13 = sand.u32 1, %s1275_s21  }
 0x24f   : > { %s823_s26 = scalar_lea.sflag [#allocation4], %s822_s13 }
 0x254   : > { %p1695_p4 = scmp.ge.s32.totalorder %s1694_s15, 2 }
 0x256   : > { %p1035_p5 = pnand %p1695_p4, %p1377_p12 }
 0x258   : > { %p1036_p7 = pneg %p1035_p5 }
 0x25a   : > { %1270 = dma.done.wait (%p1036_p7), %s823_s26, 128  }
 0x25b   : > { %1272 = vsyncadd (%p1036_p7), %s823_s26, 4294967168  ;;  %s1696_s24 = sld [smem:[#allocation14_spill]]  ;;  %s1699_s21 = smov %s1279_s22 }
 0x25c   : > { %s1697_s17 = sld [smem:[#allocation12_spill]] }
 0x25d   : > { %s1698_s23 = sld [smem:[#allocation15_spill]] }
 0x261   : > { %p22_p8 = scmp.ge.s32.totalorder %s1696_s24, 4  }
 0x262   : > { %s1700_s22 = smov %s1697_s17 }
 0x263   :  { %24 = sbr.rel (!%p22_p8) target bundleno = 9 (0x9), region = 113 }
 0x268   :  { %829 = vsyncpa [#allocation3], 1 }
 0x269   :  { %831 = vsyncpa [#allocation3 + $0x1], 1 }
 0x26a   :  { %832 = vsyncpa [#allocation6], 1 }
 0x26b   :  { %834 = vsyncpa [#allocation6 + $0x1], 1 }
 0x26c   :  { %835 = vsyncpa [#allocation4], 1 }
 0x26d   :  { %837 = vsyncpa [#allocation4 + $0x1], 1 }

</bundles_post_ra>
